<compile_context>
chip_gen: v7x
topology: tpu7x:2x2x1
jax: 0.10.0
libtpu: 0.0.40
codegen_flags: <defaults>
</compile_context>

<pallas_src>
import jax
import jax.numpy as jnp
from jax.experimental import pallas as pl
from jax.experimental.pallas import tpu as pltpu

_LANE = 128
_SUB = 8


# ----------------------------- small helpers --------------------------------

def _round_up(x, m):
    return (x + m - 1) // m * m


def _vmem_tile_bytes(rows, cols, itemsize):
    """Approximate VMEM footprint of a (rows, cols) tile (sublane/lane padded)."""
    return _round_up(max(rows, 1), _SUB) * _round_up(max(cols, 1), _LANE) * itemsize


def _tpu_vmem_capacity():
    try:
        return int(pltpu.get_tpu_info().vmem_capacity_bytes)
    except Exception:
        return 64 << 20  # conservative: one v7x TensorCore


def _mosaic_params(semantics, need_bytes, vmem_cap):
    limit = min(max(int(need_bytes) + (2 << 20), 16 << 20), (vmem_cap * 3) // 4)
    return pltpu.CompilerParams(dimension_semantics=semantics,
                                vmem_limit_bytes=int(limit))


# ------------------------------- kernels -------------------------------------

def _head_math(pooled, gamma, beta, w1, b1, w2, b2, out_dtype):
    """LayerNorm(E, eps=1e-5, biased var) -> fc1 -> ReLU -> fc2 (eval mode)."""
    mu = jnp.mean(pooled, axis=-1, keepdims=True)
    var = jnp.mean(jnp.square(pooled - mu), axis=-1, keepdims=True)
    normed = (pooled - mu) * jax.lax.rsqrt(var + 1e-5)
    normed = normed * gamma + beta
    # dropout is identity in eval mode.
    # TODO(synk): training-mode stochastic dropout not implemented.
    h = jnp.dot(normed, w1, preferred_element_type=jnp.float32) + b1
    h = jnp.maximum(h, 0.0)
    out = jnp.dot(h, w2, preferred_element_type=jnp.float32) + b2
    return out.astype(out_dtype)


def _pool_kernel(emb_ref, mask_ref, pooled_ref, sum_acc, cnt_acc):
    """Masked sum / count accumulation over seq blocks; emits pooled mean."""
    s_idx = pl.program_id(1)

    @pl.when(s_idx == 0)
    def _init():
        sum_acc[...] = jnp.zeros_like(sum_acc)
        cnt_acc[...] = jnp.zeros_like(cnt_acc)

    emb = emb_ref[...]                                    # (TB, TS, E), native dtype
    mask = mask_ref[...]                                  # (TB, TS)
    # VPU multiply + sublane reduction; f32 accumulation only.
    prod = (emb * mask.astype(emb.dtype)[:, :, None]).astype(jnp.float32)
    sum_acc[...] += jnp.sum(prod, axis=1)
    cnt_acc[...] += jnp.sum(mask.astype(jnp.float32), axis=1, keepdims=True)

    @pl.when(s_idx == pl.num_programs(1) - 1)
    def _finalize():
        counts = jnp.maximum(cnt_acc[...], 1e-9)          # clamp(min=1e-9)
        pooled_ref[...] = (sum_acc[...] / counts).astype(pooled_ref.dtype)


def _head_kernel(pooled_ref, gamma_ref, beta_ref, w1_ref, b1_ref,
                 w2_ref, b2_ref, out_ref):
    out_ref[...] = _head_math(pooled_ref[...].astype(jnp.float32),
                              gamma_ref[...], beta_ref[...],
                              w1_ref[...], b1_ref[...],
                              w2_ref[...], b2_ref[...], out_ref.dtype)


def _fused_kernel(emb_ref, mask_ref, gamma_ref, beta_ref, w1_ref, b1_ref,
                  w2_ref, b2_ref, out_ref):
    """Single-invocation fast path for tiny problems (everything resident)."""
    emb = emb_ref[...]
    mask = mask_ref[...]
    prod = (emb * mask.astype(emb.dtype)[:, :, None]).astype(jnp.float32)
    summed = jnp.sum(prod, axis=1)
    counts = jnp.maximum(
        jnp.sum(mask.astype(jnp.float32), axis=1, keepdims=True), 1e-9)
    pooled = summed / counts
    out_ref[...] = _head_math(pooled, gamma_ref[...], beta_ref[...],
                              w1_ref[...], b1_ref[...],
                              w2_ref[...], b2_ref[...], out_ref.dtype)


# ----------------------------- tiling logic -----------------------------------

def _choose_tiles(B, S, E, emb_itemsize, mask_itemsize, stream_budget):
    """Pick (TB, B_pad, TS, S_pad) for the streamed pooling kernel."""
    E_v = _round_up(E, _LANE)   # VMEM lane-padded width of an embedding row

    # Batch tile: large enough to fill the MXU and amortize per-step overhead,
    # but keep >= 2 batch blocks when the batch allows so the "parallel" grid
    # axis can shard across the two v7x TensorCores.
    TB = min(128, _round_up(B, _SUB))
    if _round_up(B, TB) // TB < 2 and B > _SUB:
        TB = max(_SUB, _round_up(TB // 2, _SUB))

    def stream_bytes(tb, ts):
        emb_tile = tb * ts * E_v * emb_itemsize
        mask_tile = tb * _round_up(ts, _LANE) * max(mask_itemsize, 4)
        return 2 * (emb_tile + mask_tile)        # double-buffered pipeline

    # Sequence tile: whole (8-padded) sequence if it is small, otherwise a
    # 128-multiple that fits the VMEM budget, minimizing padded rows streamed.
    S8 = _round_up(S, _SUB)
    if S8 <= 512 and stream_bytes(TB, S8) <= stream_budget:
        TS = S8
    else:
        def fitting(tb):
            return [ts for ts in (1024, 512, 256, 128)
                    if stream_bytes(tb, ts) <= stream_budget]
        cands = fitting(TB)
        while not cands and TB > _SUB:
            TB = max(_SUB, _round_up(TB // 2, _SUB))
            cands = fitting(TB)
        if not cands:
            cands = [128]                        # last resort
        TS = min(cands, key=lambda ts: (_round_up(S, ts), -ts))

    return TB, _round_up(B, TB), TS, _round_up(S, TS)


# ------------------------------- wrapper --------------------------------------

def transformer_classifier(token_embeddings, attention_mask,
                           gamma, beta, w1, b1, w2, b2):
    """token_embeddings: (B, S, E); attention_mask: (B, S) or None."""
    B, S, E = token_embeddings.shape
    H = w1.shape[1]
    O = w2.shape[1]

    if attention_mask is None:
        attention_mask = jnp.ones((B, S), dtype=token_embeddings.dtype)

    gamma2 = gamma.reshape(1, E)
    beta2 = beta.reshape(1, E)
    b1_2 = b1.reshape(1, H)

    # Lane-dense fc2 output: pad the class dim to 128 columns with zeros.
    O_pad = max(_LANE, _round_up(O, _LANE))
    w2p = jnp.zeros((H, O_pad), dtype=w2.dtype).at[:, :O].set(w2)
    b2p = jnp.zeros((1, O_pad), dtype=b2.dtype).at[0, :O].set(b2.reshape(O))

    emb_isz = jnp.dtype(token_embeddings.dtype).itemsize
    mask_isz = jnp.dtype(attention_mask.dtype).itemsize
    vmem_cap = _tpu_vmem_capacity()

    # -------- fast path: tiny problem -> one fused invocation, no grid -------
    fast_bytes = (B * _round_up(S, _SUB) * _round_up(E, _LANE) * emb_isz
                  + _vmem_tile_bytes(B, S, 4)
                  + _vmem_tile_bytes(E, H, 4)
                  + _vmem_tile_bytes(H, O_pad, 4)
                  + _vmem_tile_bytes(B, H, 4)
                  + _vmem_tile_bytes(B, O_pad, 4)
                  + 4 * _vmem_tile_bytes(B, E, 4))
    if fast_bytes <= (4 << 20):
        out = pl.pallas_call(
            _fused_kernel,
            out_shape=jax.ShapeDtypeStruct((B, O_pad), jnp.float32),
            compiler_params=_mosaic_params(None, fast_bytes, vmem_cap),
        )(token_embeddings, attention_mask, gamma2, beta2, w1, b1_2, w2p, b2p)
        result = out[:, :O]
        return result[:, 0] if O == 1 else result

    # -------------------- stage 1: streamed masked pooling -------------------
    stream_budget = max((vmem_cap // 2) - (4 << 20), 8 << 20)
    TB, B_pad, TS, S_pad = _choose_tiles(B, S, E, emb_isz, mask_isz,
                                         stream_budget)

    if B_pad != B or S_pad != S:
        token_embeddings = jnp.pad(
            token_embeddings, ((0, B_pad - B), (0, S_pad - S), (0, 0)))
        attention_mask = jnp.pad(
            attention_mask, ((0, B_pad - B), (0, S_pad - S)))

    grid = (B_pad // TB, S_pad // TS)
    E_v = _round_up(E, _LANE)
    pool_need = (2 * (TB * TS * E_v * emb_isz
                      + TB * _round_up(TS, _LANE) * max(mask_isz, 4))
                 + 3 * _vmem_tile_bytes(TB, E, 4)
                 + _vmem_tile_bytes(TB, 1, 4))
    pool_cost = pl.CostEstimate(
        flops=2 * B_pad * S_pad * E,
        transcendentals=0,
        bytes_accessed=(B_pad * S_pad * E * emb_isz
                        + B_pad * S_pad * mask_isz
                        + B_pad * E * 4))

    pooled = pl.pallas_call(
        _pool_kernel,
        out_shape=jax.ShapeDtypeStruct((B_pad, E), jnp.float32),
        grid_spec=pltpu.PrefetchScalarGridSpec(
            num_scalar_prefetch=0,
            grid=grid,
            in_specs=[
                pl.BlockSpec((TB, TS, E), lambda b, s: (b, s, 0)),   # emb
                pl.BlockSpec((TB, TS), lambda b, s: (b, s)),         # mask
            ],
            out_specs=pl.BlockSpec((TB, E), lambda b, s: (b, 0)),
            scratch_shapes=[
                pltpu.VMEM((TB, E), jnp.float32),   # running masked sum
                pltpu.VMEM((TB, 1), jnp.float32),   # running token counts
            ],
        ),
        compiler_params=_mosaic_params(("parallel", "arbitrary"),
                                       pool_need, vmem_cap),
        cost_estimate=pool_cost,
    )(token_embeddings, attention_mask)

    # ------------------- stage 2: LayerNorm + MLP head ------------------------
    TB2 = B_pad if B_pad <= 512 else TB
    head_need = 2 * (_vmem_tile_bytes(TB2, E, 4)
                     + 2 * _vmem_tile_bytes(1, E, 4)
                     + _vmem_tile_bytes(E, H, 4)
                     + _vmem_tile_bytes(1, H, 4)
                     + _vmem_tile_bytes(H, O_pad, 4)
                     + _vmem_tile_bytes(1, O_pad, 4)
                     + _vmem_tile_bytes(TB2, H, 4)
                     + _vmem_tile_bytes(TB2, O_pad, 4))

    out = pl.pallas_call(
        _head_kernel,
        out_shape=jax.ShapeDtypeStruct((B_pad, O_pad), jnp.float32),
        grid_spec=pltpu.PrefetchScalarGridSpec(
            num_scalar_prefetch=0,
            grid=(B_pad // TB2,),
            in_specs=[
                pl.BlockSpec((TB2, E), lambda i: (i, 0)),     # pooled
                pl.BlockSpec((1, E), lambda i: (0, 0)),       # gamma
                pl.BlockSpec((1, E), lambda i: (0, 0)),       # beta
                pl.BlockSpec((E, H), lambda i: (0, 0)),       # w1
                pl.BlockSpec((1, H), lambda i: (0, 0)),       # b1
                pl.BlockSpec((H, O_pad), lambda i: (0, 0)),   # w2 (padded)
                pl.BlockSpec((1, O_pad), lambda i: (0, 0)),   # b2 (padded)
            ],
            out_specs=pl.BlockSpec((TB2, O_pad), lambda i: (i, 0)),
        ),
        compiler_params=_mosaic_params(("parallel",), head_need, vmem_cap),
    )(pooled, gamma2, beta2, w1, b1_2, w2p, b2p)

    result = out[:B, :O]
    return result[:, 0] if O == 1 else result


# ------------------------------- reference ------------------------------------

def reference_forward(token_embeddings, attention_mask,
                      gamma, beta, w1, b1, w2, b2):
    """Plain-JAX reference mirroring the PyTorch forward (eval mode)."""
    if attention_mask is None:
        pooled = jnp.mean(token_embeddings, axis=1)
    else:
        m3 = attention_mask[:, :, None].astype(token_embeddings.dtype)
        summed = jnp.sum(token_embeddings * m3, axis=1)
        counts = jnp.maximum(jnp.sum(m3, axis=1), 1e-9)
        pooled = summed / counts
    mu = jnp.mean(pooled, axis=-1, keepdims=True)
    var = jnp.mean((pooled - mu) ** 2, axis=-1, keepdims=True)
    normed = (pooled - mu) / jnp.sqrt(var + 1e-5) * gamma + beta
    h = jnp.maximum(normed @ w1 + b1, 0.0)
    out = h @ w2 + b2
    return out[:, 0] if w2.shape[1] == 1 else out


# --------------------------------- main ----------------------------------------

if __name__ == "__main__":
    key = jax.random.PRNGKey(0)
    k_emb, k_g, k_b, k_w1, k_b1, k_w2, k_b2, k_emb2 = jax.random.split(key, 8)

    def make_params(E, H, O):
        gamma = 1.0 + 0.1 * jax.random.normal(k_g, (E,), dtype=jnp.float32)
        beta = 0.05 * jax.random.normal(k_b, (E,), dtype=jnp.float32)
        w1 = jax.random.normal(k_w1, (E, H), dtype=jnp.float32) / jnp.sqrt(E)
        b1 = 0.01 * jax.random.normal(k_b1, (H,), dtype=jnp.float32)
        w2 = jax.random.normal(k_w2, (H, O), dtype=jnp.float32) / jnp.sqrt(H)
        b2 = 0.01 * jax.random.normal(k_b2, (O,), dtype=jnp.float32)
        return gamma, beta, w1, b1, w2, b2

    def check(emb, mask, params, atol=2e-4):
        out = jax.block_until_ready(transformer_classifier(emb, mask, *params))
        ref = reference_forward(emb, mask, *params)
        assert out.shape == ref.shape, (out.shape, ref.shape)
        err = float(jnp.max(jnp.abs(out - ref)))
        assert jnp.allclose(out, ref, atol=atol, rtol=atol), err

    # 1) Small problem -> fused single-invocation fast path (with and without mask).
    B, S, E, H, O = 16, 8, 32, 128, 3           # module defaults: H=128, O=3
    params = make_params(E, H, O)
    emb = jax.random.normal(k_emb, (B, S, E), dtype=jnp.float32)
    lengths = (jnp.arange(B, dtype=jnp.int32) % S) + 1
    mask = (jnp.arange(S)[None, :] < lengths[:, None]).astype(jnp.float32)
    check(emb, mask, params)
    check(emb, None, params)                    # attention_mask=None path

    # 2) Larger problem -> gridded pooling kernel (batch + seq padding,
    #    multi-step seq accumulation) followed by the LN/MLP head kernel.
    B2, S2, E2 = 20, 600, 64
    params2 = make_params(E2, H, O)
    emb2 = jax.random.normal(k_emb2, (B2, S2, E2), dtype=jnp.float32)
    lengths2 = (jnp.arange(B2, dtype=jnp.int32) * 37) % S2 + 1
    mask2 = (jnp.arange(S2)[None, :] < lengths2[:, None]).astype(jnp.float32)
    check(emb2, mask2, params2)

    print("KERNEL_OK")
</pallas_src>

<mosaic_0001>
module attributes {stable_mosaic.version = 11 : i64} {
  func.func @_fused_kernel(%arg0: memref<16x8x32xf32, #tpu.memory_space<vmem>>, %arg1: memref<16x8xf32, #tpu.memory_space<vmem>>, %arg2: memref<1x32xf32, #tpu.memory_space<vmem>>, %arg3: memref<1x32xf32, #tpu.memory_space<vmem>>, %arg4: memref<32x128xf32, #tpu.memory_space<vmem>>, %arg5: memref<1x128xf32, #tpu.memory_space<vmem>>, %arg6: memref<128x128xf32, #tpu.memory_space<vmem>>, %arg7: memref<1x128xf32, #tpu.memory_space<vmem>>, %arg8: memref<16x128xf32, #tpu.memory_space<vmem>>) attributes {dimension_semantics = [], scalar_prefetch = 0 : i64, scratch_operands = 0 : i64, tpu.core_type = #tpu.core_type<tc>} {
    %c0 = arith.constant 0 : index
    %c0_0 = arith.constant 0 : index
    %c0_1 = arith.constant 0 : index
    %0 = vector.load %arg0[%c0, %c0_0, %c0_1] : memref<16x8x32xf32, #tpu.memory_space<vmem>>, vector<16x8x32xf32>
    %c0_2 = arith.constant 0 : index
    %c0_3 = arith.constant 0 : index
    %1 = vector.load %arg1[%c0_2, %c0_3] : memref<16x8xf32, #tpu.memory_space<vmem>>, vector<16x8xf32>
    %2 = vector.shape_cast %1 : vector<16x8xf32> to vector<16x8x1xf32>
    %3 = vector.broadcast %2 : vector<16x8x1xf32> to vector<16x8x32xf32>
    %4 = arith.mulf %0, %3 : vector<16x8x32xf32>
    %cst = arith.constant dense<0.000000e+00> : vector<16x32xf32>
    %5 = vector.multi_reduction <add>, %4, %cst [1] : vector<16x8x32xf32> to vector<16x32xf32>
    %cst_4 = arith.constant dense<0.000000e+00> : vector<16xf32>
    %6 = vector.multi_reduction <add>, %1, %cst_4 [1] : vector<16x8xf32> to vector<16xf32>
    %7 = vector.shape_cast %6 : vector<16xf32> to vector<16x1xf32>
    %cst_5 = arith.constant 9.99999971E-10 : f32
    %8 = vector.broadcast %cst_5 : f32 to vector<16x1xf32>
    %9 = arith.maximumf %7, %8 : vector<16x1xf32>
    %10 = vector.broadcast %9 : vector<16x1xf32> to vector<16x32xf32>
    %11 = arith.divf %5, %10 : vector<16x32xf32>
    %c0_6 = arith.constant 0 : index
    %c0_7 = arith.constant 0 : index
    %12 = vector.load %arg2[%c0_6, %c0_7] : memref<1x32xf32, #tpu.memory_space<vmem>>, vector<1x32xf32>
    %c0_8 = arith.constant 0 : index
    %c0_9 = arith.constant 0 : index
    %13 = vector.load %arg3[%c0_8, %c0_9] : memref<1x32xf32, #tpu.memory_space<vmem>>, vector<1x32xf32>
    %c0_10 = arith.constant 0 : index
    %c0_11 = arith.constant 0 : index
    %14 = vector.load %arg4[%c0_10, %c0_11] : memref<32x128xf32, #tpu.memory_space<vmem>>, vector<32x128xf32>
    %c0_12 = arith.constant 0 : index
    %c0_13 = arith.constant 0 : index
    %15 = vector.load %arg5[%c0_12, %c0_13] : memref<1x128xf32, #tpu.memory_space<vmem>>, vector<1x128xf32>
    %c0_14 = arith.constant 0 : index
    %c0_15 = arith.constant 0 : index
    %16 = vector.load %arg6[%c0_14, %c0_15] : memref<128x128xf32, #tpu.memory_space<vmem>>, vector<128x128xf32>
    %c0_16 = arith.constant 0 : index
    %c0_17 = arith.constant 0 : index
    %17 = vector.load %arg7[%c0_16, %c0_17] : memref<1x128xf32, #tpu.memory_space<vmem>>, vector<1x128xf32>
    %cst_18 = arith.constant dense<0.000000e+00> : vector<16xf32>
    %18 = vector.multi_reduction <add>, %11, %cst_18 [1] : vector<16x32xf32> to vector<16xf32>
    %19 = vector.shape_cast %18 : vector<16xf32> to vector<16x1xf32>
    %cst_19 = arith.constant 3.200000e+01 : f32
    %20 = vector.broadcast %cst_19 : f32 to vector<16x1xf32>
    %21 = arith.divf %19, %20 : vector<16x1xf32>
    %22 = vector.broadcast %21 : vector<16x1xf32> to vector<16x32xf32>
    %23 = arith.subf %11, %22 : vector<16x32xf32>
    %24 = arith.mulf %23, %23 : vector<16x32xf32>
    %cst_20 = arith.constant dense<0.000000e+00> : vector<16xf32>
    %25 = vector.multi_reduction <add>, %24, %cst_20 [1] : vector<16x32xf32> to vector<16xf32>
    %26 = vector.shape_cast %25 : vector<16xf32> to vector<16x1xf32>
    %cst_21 = arith.constant 3.200000e+01 : f32
    %27 = vector.broadcast %cst_21 : f32 to vector<16x1xf32>
    %28 = arith.divf %26, %27 : vector<16x1xf32>
    %29 = vector.broadcast %21 : vector<16x1xf32> to vector<16x32xf32>
    %30 = arith.subf %11, %29 : vector<16x32xf32>
    %cst_22 = arith.constant 9.99999974E-6 : f32
    %31 = vector.broadcast %cst_22 : f32 to vector<16x1xf32>
    %32 = arith.addf %28, %31 : vector<16x1xf32>
    %33 = math.rsqrt %32 : vector<16x1xf32>
    %34 = vector.broadcast %33 : vector<16x1xf32> to vector<16x32xf32>
    %35 = arith.mulf %30, %34 : vector<16x32xf32>
    %36 = vector.broadcast %12 : vector<1x32xf32> to vector<16x32xf32>
    %37 = arith.mulf %35, %36 : vector<16x32xf32>
    %38 = vector.broadcast %13 : vector<1x32xf32> to vector<16x32xf32>
    %39 = arith.addf %37, %38 : vector<16x32xf32>
    %cst_23 = arith.constant dense<0.000000e+00> : vector<16x128xf32>
    %40 = tpu.matmul %39, %14, %cst_23 {dimension_numbers = #tpu.dot_dimension_numbers<[1], [0], [0], [1], [0, 0, 1, 1], [], []>} : vector<16x32xf32>, vector<32x128xf32>, vector<16x128xf32> -> vector<16x128xf32>
    %41 = vector.broadcast %15 : vector<1x128xf32> to vector<16x128xf32>
    %42 = arith.addf %40, %41 : vector<16x128xf32>
    %cst_24 = arith.constant 0.000000e+00 : f32
    %43 = vector.broadcast %cst_24 : f32 to vector<16x128xf32>
    %44 = arith.maximumf %42, %43 : vector<16x128xf32>
    %cst_25 = arith.constant dense<0.000000e+00> : vector<16x128xf32>
    %45 = tpu.matmul %44, %16, %cst_25 {dimension_numbers = #tpu.dot_dimension_numbers<[1], [0], [0], [1], [0, 0, 1, 1], [], []>} : vector<16x128xf32>, vector<128x128xf32>, vector<16x128xf32> -> vector<16x128xf32>
    %46 = vector.broadcast %17 : vector<1x128xf32> to vector<16x128xf32>
    %47 = arith.addf %45, %46 : vector<16x128xf32>
    %c0_26 = arith.constant 0 : index
    %c0_27 = arith.constant 0 : index
    %48 = vector.load %arg8[%c0_26, %c0_27] : memref<16x128xf32, #tpu.memory_space<vmem>>, vector<16x128xf32>
    tpu.vector_store %arg8[%c0_26, %c0_27], %47 {strides = array<i32>} : memref<16x128xf32, #tpu.memory_space<vmem>>, vector<16x128xf32>,
    return
  }
}

</mosaic_0001>

<bundles_post_ra>
// kernel: tpu_custom_call.1
= control target key start
LH: loop header
LB: loop body
LE: loop exit
PB: predicated region body
PF: predicated region fallthrough
CT: control target
= control target key end

     0   :  { %13 = vsyncpa [#allocation3], 0  ;;  %s1564_s0 = inlined_call_operand.hbm [shape: f32[16,8,32], index: 0, kind: input, shape index: {}]   ;;  %s1565_s1 = inlined_call_operand.vmem [shape: f32[16,8], index: 1, kind: input, shape index: {}]   ;;  %s1566_s2 = inlined_call_operand.vmem [shape: f32[1,32], index: 2, kind: input, shape index: {}]   ;;  %s1567_s3 = inlined_call_operand.vmem [shape: f32[1,32], index: 3, kind: input, shape index: {}]   ;;  %s1568_s4 = inlined_call_operand.vmem [shape: f32[32,128], index: 4, kind: input, shape index: {}]   ;;  %s1569_s5 = inlined_call_operand.vmem [shape: f32[1,128], index: 5, kind: input, shape index: {}]   ;;  %s1570_s6 = inlined_call_operand.hbm [shape: f32[128,128], index: 6, kind: input, shape index: {}]   ;;  %s1571_s7 = inlined_call_operand.vmem [shape: f32[1,128], index: 7, kind: input, shape index: {}]   ;;  %s1572_s8 = inlined_call_operand.hbm [shape: f32[16,128], index: 8, kind: output, shape index: {}]  }
   0x1   :  { %14 = vsyncpa [#allocation6], 0 }
   0x2   :  { %15 = vsyncpa [#allocation4], 0  ;;  %s1151_s27 = smov [#allocation2]   ;;  %s1079_s9 = scalar_lea.hbm %s1564_s0, 2048 }
   0x3   :  { %s21_s28 = sshll.u32 %s1151_s27, 4  ;;  %p1080_p0 = scmp.ne.s32.totalorder %s1564_s0, %s1079_s9  ;;  %s22_s28 = int_to_ptr.vmem [resolvable:$true] %s21_s28 }
   0x4   :  { %p1083_p1 = scmp.lt.u32.totalorder %s1079_s9, %s1564_s0 }
   0x6   :  { %p1085_p2 = pnand %p1083_p1, %p1080_p0 }
   0x8   :  { %1088 = shalt.err (!%p1085_p2)
}
   0x9   :  { %s1089_s14 = scalar_lea.vmem %s22_s28, 2048  ;;  %p1094_p4 = scmp.lt.s32.totalorder %s22_s28, %s22_s28 }
   0xa   :  { %p1090_p3 = scmp.ne.s32.totalorder %s22_s28, %s1089_s14  ;;  %p1095_p5 = scmp.lt.s32.totalorder %s1089_s14, %s1089_s14 }
   0xc   :  { %p1096_p6 = por %p1095_p5, %p1094_p4 }
   0xe   :  { %p1097_p7 = pnand %p1096_p6, %p1090_p3 }
  0x10   :  { %1100 = shalt.err (!%p1097_p7)
}
  0x11   :  { %s1152_s15 = smov 128   ;;  %s1153_s16 = smov 8  }
  0x12   :  { %27 = dma.hbm_to_vmem [thread:$0]  %s1564_s0, 2048, %s22_s28, [#allocation3], %s1152_s15, %s1152_s15, %s1153_s16  }
  0x13   :  { %s1154_s19 = smov [#allocation5]   ;;  %s1101_s23 = scalar_lea.hbm %s1570_s6, 2048 }
  0x14   :  { %s43_s20 = sshll.u32 %s1154_s19, 4  ;;  %p1102_p8 = scmp.ne.s32.totalorder %s1570_s6, %s1101_s23  ;;  %s44_s20 = int_to_ptr.vmem [resolvable:$true] %s43_s20 }
  0x15   :  { %p1105_p9 = scmp.lt.u32.totalorder %s1101_s23, %s1570_s6 }
  0x17   :  { %p1107_p10 = pnand %p1105_p9, %p1102_p8 }
  0x19   :  { %1110 = shalt.err (!%p1107_p10)
}
  0x1a   :  { %s1111_s29 = scalar_lea.vmem %s44_s20, 2048  ;;  %p1116_p12 = scmp.lt.s32.totalorder %s44_s20, %s44_s20 }
  0x1b   :  { %p1112_p11 = scmp.ne.s32.totalorder %s44_s20, %s1111_s29  ;;  %p1117_p13 = scmp.lt.s32.totalorder %s1111_s29, %s1111_s29 }
  0x1d   :  { %p1118_p0 = por %p1117_p13, %p1116_p12 }
  0x1f   :  { %p1119_p1 = pnand %p1118_p0, %p1112_p11 }
  0x21   :  { %1122 = shalt.err (!%p1119_p1)
}
  0x22   :  { %49 = dma.hbm_to_vmem [thread:$0]  %s1570_s6, 2048, %s44_s20, [#allocation6], %s1152_s15, %s1152_s15, %s1153_s16  }
  0x23   :  { %1145 = dma.done.wait [#allocation3], 2048  }
  0x24   :  { %1146 = vsyncadd [#allocation3], 4294965248 }
  0x25   :  { %1147 = dma.done.wait [#allocation6], 2048  }
  0x26   :  { %1148 = vsyncadd [#allocation6], 4294965248  ;;  %v76_v0 = vlaneseq  ;;  %vm317_vm0 = vcmask 64512   ;;  %v74_v4 = vld [vmem:[%s1565_s1] sm:$0xff]  ;;  %v75_v5 = vld [vmem:[%s1565_s1 + $0x8] sm:$0xff]  ;;  %vm204_vm1 = vcmask 261120  }
  0x27   :  { %v318_v6 = vsel %vm317_vm0, %v74_v4, 0.0  ;;  %v321_v8 = vsel %vm317_vm0, %v75_v5, 0.0  ;;  %v59_v31 = vld [vmem:[#allocation2 + $0x8] sm:$0xff]  ;;  %v60_v32 = vld [vmem:[#allocation2 + $0x10] sm:$0xff]  ;;  %v58_v36 = vld [vmem:[#allocation2] sm:$0xff]  ;;  %vm431_vm2 = vcmask 1041409  }
  0x28   :  { %v77_v1 = vshrl.u32 %v76_v0, 7  ;;  %319 = vadd.xlane.f32.xlu0 %v318_v6  ;;  %v61_v41 = vld [vmem:[#allocation2 + $0x18] sm:$0xff]  ;;  %v68_v48 = vld [vmem:[#allocation2 + $0x50] sm:$0xff]  ;;  %v62_v57 = vld [vmem:[#allocation2 + $0x20] sm:$0xff]  ;;  %vm434_vm3 = vcmask 1042434   ;;  %vm437_vm4 = vcmask 1043459  }
  0x29   :  { %vm440_vm5 = vcmask 1044484   ;;  %vm443_vm6 = vcmask 1045509   ;;  %vm449_vm7 = vcmask 1047559   ;;  %vm446_vm8 = vcmask 1046534   ;;  %s1155_s25 = smov [#allocation7]  }
  0x2a   :  { %v85_v2 = vsub.s32 1, %v77_v1  ;;  %v92_v3 = vsub.s32 2, %v77_v1  ;;  %v78_v10 = vsub.s32 0, %v77_v1  ;;  %v99_v12 = vsub.s32 3, %v77_v1  ;;  %s909_s26 = sshll.u32 %s1155_s25, 4  ;;  %s910_s26 = int_to_ptr.vmem [resolvable:$true] %s909_s26 }
  0x2b   :  { %v106_v15 = vsub.s32 4, %v77_v1  ;;  %v113_v19 = vsub.s32 5, %v77_v1  ;;  %v120_v22 = vsub.s32 6, %v77_v1  ;;  %v127_v25 = vsub.s32 7, %v77_v1  ;;  %p1128_p3 = scmp.lt.s32.totalorder %s910_s26, %s910_s26 }
  0x2c   :  { %v86_v7 = vrot.slane %v74_v4, %v85_v2  ;;  %v93_v9 = vrot.slane %v74_v4, %v92_v3  ;;  %322 = vadd.xlane.f32.xlu0 %v321_v8  ;;  %v79_v11 = vrot.slane %v74_v4, %v78_v10  ;;  %v100_v13 = vrot.slane %v74_v4, %v99_v12 }
  0x2d   :  { %v149_v14 = vrot.slane %v75_v5, %v92_v3  ;;  %v107_v16 = vrot.slane %v74_v4, %v106_v15  ;;  %v135_v17 = vrot.slane %v75_v5, %v78_v10  ;;  %v142_v18 = vrot.slane %v75_v5, %v85_v2  ;;  %v66_v2 = vld [vmem:[#allocation2 + $0x40] sm:$0xff] }
  0x2e   :  { %88 = vbcast.lane.b32.xlu1 %v86_v7, 256  ;;  %v156_v20 = vrot.slane %v75_v5, %v99_v12  ;;  %v114_v21 = vrot.slane %v74_v4, %v113_v19  ;;  %v163_v23 = vrot.slane %v75_v5, %v106_v15  ;;  %v121_v24 = vrot.slane %v74_v4, %v120_v22 }
  0x2f   :  { %v170_v26 = vrot.slane %v75_v5, %v113_v19  ;;  %v128_v27 = vrot.slane %v74_v4, %v127_v25  ;;  %v177_v28 = vrot.slane %v75_v5, %v120_v22  ;;  %v184_v29 = vrot.slane %v75_v5, %v127_v25  ;;  %v69_v19 = vld [vmem:[#allocation2 + $0x58] sm:$0xff] }
  0x32   :  { %95 = vbcast.lane.b32.xlu1 %v93_v9, 256 }
  0x36   :  { %81 = vbcast.lane.b32.xlu1 %v79_v11, 256 }
  0x3a   :  { %102 = vbcast.lane.b32.xlu1 %v100_v13, 256 }
  0x3e   :  { %151 = vbcast.lane.b32.xlu1 %v149_v14, 256 }
  0x42   :  { %109 = vbcast.lane.b32.xlu1 %v107_v16, 256  ;;  %144 = vbcast.lane.b32.xlu0 %v142_v18, 256 }
  0x46   :  { %137 = vbcast.lane.b32.xlu1 %v135_v17, 256  ;;  %116 = vbcast.lane.b32.xlu0 %v114_v21, 256 }
  0x4a   :  { %158 = vbcast.lane.b32.xlu1 %v156_v20, 256  ;;  %123 = vbcast.lane.b32.xlu0 %v121_v24, 256 }
  0x4e   :  { %165 = vbcast.lane.b32.xlu1 %v163_v23, 256  ;;  %130 = vbcast.lane.b32.xlu0 %v128_v27, 256 }
  0x52   :  { %172 = vbcast.lane.b32.xlu1 %v170_v26, 256  ;;  %186 = vbcast.lane.b32.xlu0 %v184_v29, 256  ;;  %v70_v26 = vld [vmem:[#allocation2 + $0x60] sm:$0xff] }
  0x56   :  { %179 = vbcast.lane.b32.xlu1 %v177_v28, 256 }
  0xa0   :  { %v89_v30 = vpop.permute.xlu1 %88 }
  0xa1   :  { %v189_v34 = vmul.f32 %v89_v30, %v59_v31  ;;  %v67_v31 = vld [vmem:[#allocation2 + $0x48] sm:$0xff] }
  0xa3   :  { %v212_v38 = vsel %vm204_vm1, %v189_v34, 0.0 }
  0xa4   :  { %v96_v33 = vpop.permute.xlu1 %95  ;;  %v213_v43 = vrot.slane %v212_v38, 4 }
  0xa5   :  { %v190_v35 = vmul.f32 %v96_v33, %v60_v32 }
  0xa6   :  { %v214_v50 = vadd.f32 %v213_v43, %v212_v38 }
  0xa7   :  { %v219_v40 = vsel %vm204_vm1, %v190_v35, 0.0 }
  0xa8   :  { %v82_v37 = vpop.permute.xlu1 %81  ;;  %v220_v45 = vrot.slane %v219_v40, 4  ;;  %v215_v59 = vrot.slane %v214_v50, 2 }
  0xa9   :  { %v188_v39 = vmul.f32 %v82_v37, %v58_v36 }
  0xaa   :  { %v221_v53 = vadd.f32 %v220_v45, %v219_v40  ;;  %v216_v4 = vadd.f32 %v215_v59, %v214_v50  ;;  %v63_v50 = vld [vmem:[#allocation2 + $0x28] sm:$0xff]  ;;  %v72_v59 = vld [vmem:[#allocation2 + $0x70] sm:$0xff] }
  0xab   :  { %v205_v42 = vsel %vm204_vm1, %v188_v39, 0.0 }
  0xac   :  { %v103_v44 = vpop.permute.xlu1 %102  ;;  %v206_v47 = vrot.slane %v205_v42, 4  ;;  %v222_v61 = vrot.slane %v221_v53, 2  ;;  %v217_v15 = vrot.slane %v216_v4, 1 }
  0xad   :  { %v191_v46 = vmul.f32 %v103_v44, %v61_v41  ;;  %v71_v41 = vld [vmem:[#allocation2 + $0x68] sm:$0xff] }
  0xae   :  { %v207_v55 = vadd.f32 %v206_v47, %v205_v42  ;;  %v223_v7 = vadd.f32 %v222_v61, %v221_v53  ;;  %v1246_v28 = vadd.f32 %v217_v15, %v216_v4 }
  0xaf   :  { %v226_v49 = vsel %vm204_vm1, %v191_v46, 0.0 }
  0xb0   :  { %v227_v51 = vrot.slane %v226_v49, 4  ;;  %v152_v52 = vpop.permute.xlu1 %151  ;;  %v208_v63 = vrot.slane %v207_v55, 2  ;;  %v224_v20 = vrot.slane %v223_v7, 1 }
  0xb1   :  { %v198_v54 = vmul.f32 %v152_v52, %v68_v48 }
  0xb2   :  { %v228_v56 = vadd.f32 %v227_v51, %v226_v49  ;;  %v209_v9 = vadd.f32 %v208_v63, %v207_v55  ;;  %v1249_v33 = vadd.f32 %v224_v20, %v223_v7 }
  0xb3   :  { %v275_v58 = vsel %vm204_vm1, %v198_v54, 0.0 }
  0xb4   :  { %v110_v60 = vpop.permute.xlu1 %109  ;;  %v229_v0 = vrot.slane %v228_v56, 2  ;;  %v276_v1 = vrot.slane %v275_v58, 4  ;;  %v210_v22 = vrot.slane %v209_v9, 1 }
  0xb5   :  { %v192_v62 = vmul.f32 %v110_v60, %v62_v57  ;;  %v320_v13 = vpop.xlane.xlu0 %319 }
  0xb6   :  { %v230_v10 = vadd.f32 %v229_v0, %v228_v56  ;;  %v277_v11 = vadd.f32 %v276_v1, %v275_v58  ;;  %v1244_v17 = vmax.f32 %v320_v13, 1e-09  ;;  %v1253_v37 = vadd.f32 %v210_v22, %v209_v9 }
  0xb7   :  { %v233_v3 = vsel %vm204_vm1, %v192_v62, 0.0 }
  0xb8   :  { %v234_v5 = vrot.slane %v233_v3, 4  ;;  %v138_v6 = vpop.permute.xlu1 %137  ;;  %v231_v23 = vrot.slane %v230_v10, 1  ;;  %v278_v24 = vrot.slane %v277_v11, 2  ;;  %v332_v32 = vrot.slane %v1244_v17, 5 }
  0xb9   :  { %v196_v8 = vmul.f32 %v138_v6, %v66_v2  ;;  %v323_v25 = vpop.xlane.xlu0 %322  ;;  %v333_v42 = vrot.slane %v1244_v17, 6  ;;  %v328_v43 = vrot.slane %v1244_v17, 1  ;;  %v329_v51 = vrot.slane %v1244_v17, 2  ;;  %v64_v6 = vld [vmem:[#allocation2 + $0x30] sm:$0xff] }
  0xba   :  { %v235_v12 = vadd.f32 %v234_v5, %v233_v3  ;;  %v1251_v35 = vmax.f32 %v323_v25, 1e-09  ;;  %v1255_v38 = vadd.f32 %v231_v23, %v230_v10  ;;  %v1257_v39 = vadd.f32 %v278_v24, %v277_v11 }
  0xbb   :  { %v261_v14 = vsel %vm204_vm1, %v196_v8, 0.0  ;;  %1043 = vrcp.f32 %v332_v32  ;;  %v330_v60 = vrot.slane %v1244_v17, 3  ;;  %v331_v24 = vrot.slane %v1244_v17, 4 }
  0xbc   :  { %v236_v16 = vrot.slane %v235_v12, 2  ;;  %v159_v18 = vpop.permute.xlu1 %158  ;;  %v262_v21 = vrot.slane %v261_v14, 4  ;;  %v338_v53 = vrot.slane %v1251_v35, 4  ;;  %1045 = vrcp.f32 %v333_v42 }
  0xbd   :  { %v199_v27 = vmul.f32 %v159_v18, %v69_v19  ;;  %v145_v40 = vpop.permute.xlu0 %144  ;;  %v335_v61 = vrot.slane %v1251_v35, 1  ;;  %v339_v62 = vrot.slane %v1251_v35, 5 }
  0xbe   :  { %v237_v29 = vadd.f32 %v236_v16, %v235_v12  ;;  %v263_v34 = vadd.f32 %v262_v21, %v261_v14  ;;  %v197_v46 = vmul.f32 %v145_v40, %v67_v31  ;;  %1047 = vrcp.f32 %v338_v53  ;;  %v65_v21 = vld [vmem:[#allocation2 + $0x38] sm:$0xff] }
  0xbf   :  { %v282_v44 = vsel %vm204_vm1, %v199_v27, 0.0  ;;  %v340_v12 = vrot.slane %v1251_v35, 6  ;;  %1049 = vrcp.f32 %v1244_v17 }
  0xc0   :  { %v166_v30 = vpop.permute.xlu1 %165  ;;  %v238_v47 = vrot.slane %v237_v29, 1  ;;  %v264_v52 = vrot.slane %v263_v34, 2  ;;  %v268_v54 = vsel %vm204_vm1, %v197_v46, 0.0  ;;  %v283_v56 = vrot.slane %v282_v44, 4 }
  0xc1   :  { %v200_v36 = vmul.f32 %v166_v30, %v70_v26  ;;  %v269_v57 = vrot.slane %v268_v54, 4  ;;  %v117_v58 = vpop.permute.xlu0 %116  ;;  %1051 = vrcp.f32 %v328_v43  ;;  %v73_v43 = vld [vmem:[#allocation2 + $0x78] sm:$0xff] }
  0xc2   :  { %v193_v0 = vmul.f32 %v117_v58, %v63_v50  ;;  %v1270_v1 = vadd.f32 %v238_v47, %v237_v29  ;;  %v1272_v7 = vadd.f32 %v264_v52, %v263_v34  ;;  %v284_v10 = vadd.f32 %v283_v56, %v282_v44 }
  0xc3   :  { %v289_v45 = vsel %vm204_vm1, %v200_v36, 0.0  ;;  %v270_v3 = vadd.f32 %v269_v57, %v268_v54  ;;  %1053 = vrcp.f32 %v335_v61  ;;  %v334_v44 = vrot.slane %v1244_v17, 7 }
  0xc4   :  { %v290_v48 = vrot.slane %v289_v45, 4  ;;  %v173_v49 = vpop.permute.xlu1 %172  ;;  %v240_v8 = vsel %vm204_vm1, %v193_v0, 0.0  ;;  %1055 = vrcp.f32 %v329_v51  ;;  %v266_v26 = vrot.slane %v1272_v7, 1 }
  0xc5   :  { %v201_v55 = vmul.f32 %v173_v49, %v71_v41  ;;  %v271_v11 = vrot.slane %v270_v3, 2  ;;  %v124_v13 = vpop.permute.xlu0 %123  ;;  %v241_v14 = vrot.slane %v240_v8, 4  ;;  %v1280_v25 = vpop.eup %1043  ;;  %v285_v27 = vrot.slane %v284_v10, 2 }
  0xc6   :  { %v291_v2 = vadd.f32 %v290_v48, %v289_v45  ;;  %v194_v16 = vmul.f32 %v124_v13, %v64_v6  ;;  %1057 = vrcp.f32 %v339_v62  ;;  %v1046_v36 = vpop.eup %1045  ;;  %v336_v51 = vrot.slane %v1251_v35, 2 }
  0xc7   :  { %v296_v63 = vsel %vm204_vm1, %v201_v55, 0.0  ;;  %v242_v22 = vadd.f32 %v241_v14, %v240_v8  ;;  %v272_v29 = vadd.f32 %v271_v11, %v270_v3  ;;  %1059 = vrcp.f32 %v330_v60 }
  0xc8   :  { %v297_v4 = vrot.slane %v296_v63, 4  ;;  %v180_v5 = vpop.permute.xlu1 %179  ;;  %v292_v18 = vrot.slane %v291_v2, 2  ;;  %v247_v23 = vsel %vm204_vm1, %v194_v16, 0.0  ;;  %1061 = vrcp.f32 %v331_v24  ;;  %v1290_v52 = vpop.eup %1047 }
  0xc9   :  { %v202_v9 = vmul.f32 %v180_v5, %v72_v59  ;;  %v131_v30 = vpop.permute.xlu0 %130  ;;  %v243_v31 = vrot.slane %v242_v22, 2  ;;  %v248_v32 = vrot.slane %v247_v23, 4  ;;  %v1287_v48 = vadd.f32 %v285_v27, %v284_v10  ;;  %v1050_v17 = vpop.eup %1049 }
  0xca   :  { %v298_v19 = vadd.f32 %v297_v4, %v296_v63  ;;  %v195_v34 = vmul.f32 %v131_v30, %v65_v21  ;;  %v1283_v40 = vadd.f32 %v292_v18, %v291_v2  ;;  %v273_v49 = vrot.slane %v272_v29, 1 }
  0xcb   :  { %v303_v15 = vsel %vm204_vm1, %v202_v9, 0.0  ;;  %v244_v45 = vadd.f32 %v243_v31, %v242_v22  ;;  %v249_v46 = vadd.f32 %v248_v32, %v247_v23  ;;  %1063 = vrcp.f32 %v340_v12  ;;  %v1052_v61 = vpop.eup %1051 }
  0xcc   :  { %v304_v20 = vrot.slane %v303_v15, 4  ;;  %v299_v41 = vrot.slane %v298_v19, 2  ;;  %v254_v47 = vsel %vm204_vm1, %v195_v34, 0.0  ;;  %v294_v57 = vrot.slane %v1283_v40, 1 }
  0xcd   :  { %v187_v50 = vpop.permute.xlu0 %186  ;;  %v245_v53 = vrot.slane %v244_v45, 1  ;;  %v250_v54 = vrot.slane %v249_v46, 2  ;;  %v255_v55 = vrot.slane %v254_v47, 4  ;;  %v337_v59 = vrot.slane %v1251_v35, 3  ;;  %v1054_v3 = vpop.eup %1053 }
  0xce   :  { %v305_v42 = vadd.f32 %v304_v20, %v303_v15  ;;  %v203_v56 = vmul.f32 %v187_v50, %v73_v43  ;;  %v1293_v58 = vadd.f32 %v299_v41, %v298_v19  ;;  %v341_v60 = vrot.slane %v1251_v35, 7  ;;  %v1056_v8 = vpop.eup %1055 }
  0xcf   :  { %v251_v63 = vadd.f32 %v250_v54, %v249_v46  ;;  %v256_v0 = vadd.f32 %v255_v55, %v254_v47  ;;  %v274_v4 = vadd.f32 %v273_v49, %v272_v29  ;;  %v1299_v6 = vmul.f32 %v1052_v61, %v1246_v28 }
  0xd0   :  { %v306_v62 = vrot.slane %v305_v42, 2  ;;  %v310_v2 = vsel %vm204_vm1, %v203_v56, 0.0  ;;  %1065 = vrcp.f32 %v334_v44  ;;  %v246_v9 = vadd.f32 %v245_v53, %v244_v45  ;;  %v1302_v12 = vpop.eup %1057 }
  0xd1   :  { %v311_v5 = vrot.slane %v310_v2, 4  ;;  %v252_v10 = vrot.slane %v251_v63, 1  ;;  %v257_v11 = vrot.slane %v256_v0, 2  ;;  %1067 = vrcp.f32 %v1251_v35  ;;  %v1060_v28 = vpop.eup %1059 }
  0xd2   :  { %v1305_v14 = vmul.f32 %v1050_v17, %v1253_v37  ;;  %v1308_v15 = vmul.f32 %v1056_v8, %v1249_v33  ;;  %v430_v16 = vrot.slane %v1299_v6, 7  ;;  %v307_v18 = vadd.f32 %v306_v62, %v305_v42  ;;  %v1062_v23 = vpop.eup %1061 }
  0xd3   :  { %v312_v13 = vadd.f32 %v311_v5, %v310_v2  ;;  %v253_v19 = vadd.f32 %v252_v10, %v251_v63  ;;  %v258_v20 = vadd.f32 %v257_v11, %v256_v0  ;;  %1069 = vrcp.f32 %v336_v51 }
  0xd4   :  { %v1312_v22 = vmul.f32 %v1060_v28, %v1255_v38  ;;  %v432_v35 = vsel %vm431_vm2, %v430_v16, %v1305_v14  ;;  %v433_v37 = vrot.slane %v1308_v15, 6  ;;  %v1317_v24 = vmul.f32 %v1054_v3, %v274_v4 }
  0xd5   :  { %v313_v21 = vrot.slane %v312_v13, 2  ;;  %v1320_v33 = vmul.f32 %v1280_v25, %v246_v9  ;;  %v259_v27 = vrot.slane %v258_v20, 1  ;;  %1071 = vrcp.f32 %v337_v59  ;;  %v1064_v29 = vpop.eup %1063 }
  0xd6   :  { %v1322_v30 = vmul.f32 %v1046_v36, %v253_v19  ;;  %v1325_v38 = vmul.f32 %v1062_v23, %v1270_v1  ;;  %v435_v32 = vsel %vm434_vm3, %v433_v37, %v432_v35  ;;  %v308_v34 = vrot.slane %v307_v18, 1 }
  0xd7   :  { %v314_v31 = vadd.f32 %v313_v21, %v312_v13  ;;  %v260_v41 = vadd.f32 %v259_v27, %v258_v20  ;;  %v436_v42 = vrot.slane %v1312_v22, 5  ;;  %1073 = vrcp.f32 %v341_v60 }
  0xd8   :  { %v280_v43 = vrot.slane %v1257_v39, 1  ;;  %v287_v25 = vrot.slane %v1287_v48, 1  ;;  %v301_v44 = vrot.slane %v1293_v58, 1  ;;  %v267_v36 = vadd.f32 %v266_v26, %v1272_v7 }
  0xd9   :  { %v438_v1 = vsel %vm437_vm4, %v436_v42, %v435_v32  ;;  %v442_v45 = vrot.slane %v1320_v33, 3  ;;  %v315_v47 = vrot.slane %v314_v31, 1  ;;  %v439_v49 = vrot.slane %v1325_v38, 4 }
  0xda   :  { %v1066_v46 = vpop.eup %1065  ;;  %v445_v50 = vrot.slane %v1322_v30, 2  ;;  %v295_v53 = vadd.f32 %v294_v57, %v1283_v40  ;;  %v451_v54 = vrot.slane %v1317_v24, 7  ;;  %v309_v55 = vadd.f32 %v308_v34, %v307_v18 }
  0xdb   :  { %v1068_v51 = vpop.eup %1067  ;;  %v373_v56 = vmul.f32 %v1066_v46, %v260_v41  ;;  %v281_v7 = vadd.f32 %v280_v43, %v1257_v39  ;;  %v288_v26 = vadd.f32 %v287_v25, %v1287_v48  ;;  %v302_v17 = vadd.f32 %v301_v44, %v1293_v58 }
  0xdc   :  { %v441_v59 = vsel %vm440_vm5, %v439_v49, %v438_v1  ;;  %v1346_v63 = vmul.f32 %v1068_v51, %v267_v36  ;;  %v316_v40 = vadd.f32 %v315_v47, %v314_v31  ;;  %v1352_v39 = vmul.f32 %v1290_v52, %v295_v53 }
  0xdd   :  { %v1070_v60 = vpop.eup %1069  ;;  %v444_v61 = vsel %vm443_vm6, %v442_v45, %v441_v59  ;;  %v448_v62 = vrot.slane %v373_v56, 1  ;;  %v1354_v48 = vmul.f32 %v1064_v29, %v309_v55  ;;  %v1360_v4 = vmul.f32 %v1302_v12, %v302_v17 }
  0xde   :  { %v447_v57 = vsel %vm446_vm8, %v445_v50, %v444_v61  ;;  %v1349_v0 = vmul.f32 %v1070_v60, %v281_v7  ;;  %v452_v3 = vsel %vm431_vm2, %v451_v54, %v1346_v63  ;;  %v457_v16 = vrot.slane %v1352_v39, 4 }
  0xdf   :  { %v1072_v2 = vpop.eup %1071  ;;  %v450_v58 = vsel %vm449_vm7, %v448_v62, %v447_v57  ;;  %v461_v28 = vrot.slane %v1354_v48, 2  ;;  %v459_v18 = vrot.slane %v1360_v4, 3 }
  0xe0   :  { %v467_v5 = vsel %vm204_vm1, %v450_v58, 0.0  ;;  %v1363_v8 = vmul.f32 %v1072_v2, %v288_v26  ;;  %v453_v9 = vrot.slane %v1349_v0, 6 }
  0xe1   :  { %v1074_v10 = vpop.eup %1073  ;;  %468 = vadd.xlane.f32.xlu1 %v467_v5 }
  0xe2   :  { %v1366_v52 = vmul.f32 %v1074_v10, %v316_v40  ;;  %v454_v11 = vsel %vm434_vm3, %v453_v9, %v452_v3  ;;  %v455_v13 = vrot.slane %v1363_v8, 5 }
  0xe4   :  { %v456_v12 = vsel %vm437_vm4, %v455_v13, %v454_v11  ;;  %v463_v19 = vrot.slane %v1366_v52, 1 }
  0xe5   :  { %v458_v20 = vsel %vm440_vm5, %v457_v16, %v456_v12 }
  0xe6   :  { %v460_v21 = vsel %vm443_vm6, %v459_v18, %v458_v20 }
  0xe7   :  { %v462_v35 = vsel %vm446_vm8, %v461_v28, %v460_v21 }
  0xe8   :  { %v464_v37 = vsel %vm449_vm7, %v463_v19, %v462_v35 }
  0xe9   :  { %v470_v23 = vsel %vm204_vm1, %v464_v37, 0.0 }
  0xea   :  { %471 = vadd.xlane.f32.xlu0 %v470_v23 }
 0x16e   :  { %v469_v27 = vpop.xlane.xlu1 %468 }
 0x16f   :  { %v474_v29 = vmul.f32 0.03125, %v469_v27 }
 0x171   :  { %v478_v31 = vrot.slane %v474_v29, 1  ;;  %v479_v32 = vrot.slane %v474_v29, 2  ;;  %v480_v34 = vrot.slane %v474_v29, 3  ;;  %v481_v41 = vrot.slane %v474_v29, 4 }
 0x172   :  { %v482_v42 = vrot.slane %v474_v29, 5  ;;  %v483_v43 = vrot.slane %v474_v29, 6  ;;  %v484_v25 = vrot.slane %v474_v29, 7  ;;  %v1381_v44 = vsub.f32 %v1305_v14, %v474_v29 }
 0x173   :  { %v1384_v36 = vsub.f32 %v1299_v6, %v478_v31  ;;  %v1387_v1 = vsub.f32 %v1308_v15, %v479_v32  ;;  %v1390_v45 = vsub.f32 %v1312_v22, %v480_v34  ;;  %v1393_v46 = vsub.f32 %v1325_v38, %v481_v41 }
 0x174   :  { %v1396_v47 = vsub.f32 %v1320_v33, %v482_v42  ;;  %v1399_v49 = vsub.f32 %v1322_v30, %v483_v43  ;;  %v1401_v14 = vsub.f32 %v373_v56, %v484_v25  ;;  %v524_v53 = vmul.f32 %v1381_v44, %v1381_v44 }
 0x175   :  { %v525_v6 = vmul.f32 %v1384_v36, %v1384_v36  ;;  %v526_v15 = vmul.f32 %v1387_v1, %v1387_v1  ;;  %v527_v22 = vmul.f32 %v1390_v45, %v1390_v45  ;;  %v528_v38 = vmul.f32 %v1393_v46, %v1393_v46 }
 0x176   :  { %v529_v33 = vmul.f32 %v1396_v47, %v1396_v47  ;;  %v530_v30 = vmul.f32 %v1399_v49, %v1399_v49  ;;  %v531_v50 = vmul.f32 %v1401_v14, %v1401_v14 }
 0x177   :  { %v472_v51 = vpop.xlane.xlu0 %471  ;;  %v556_v54 = vrot.slane %v525_v6, 7  ;;  %v558_v55 = vrot.slane %v526_v15, 6  ;;  %v560_v7 = vrot.slane %v527_v22, 5  ;;  %v562_v26 = vrot.slane %v528_v38, 4 }
 0x178   :  { %v475_v56 = vmul.f32 0.03125, %v472_v51  ;;  %v564_v59 = vrot.slane %v529_v33, 3  ;;  %v566_v60 = vrot.slane %v530_v30, 2  ;;  %v568_v61 = vrot.slane %v531_v50, 1  ;;  %v392_v51 = vld [vmem:[%s1568_s4] sm:$0xff] }
 0x179   :  { %v557_v17 = vsel %vm431_vm2, %v556_v54, %v524_v53  ;;  %v393_v53 = vld [vmem:[%s1568_s4 + $0x8] sm:$0xff]  ;;  %v394_v54 = vld [vmem:[%s1568_s4 + $0x10] sm:$0xff] }
 0x17a   :  { %v559_v62 = vsel %vm434_vm3, %v558_v55, %v557_v17  ;;  %v485_v40 = vrot.slane %v475_v56, 1  ;;  %v486_v57 = vrot.slane %v475_v56, 2  ;;  %v487_v2 = vrot.slane %v475_v56, 3  ;;  %v398_v17 = vld [vmem:[#allocation5 + $0x8] sm:$0xff] }
 0x17b   :  { %v561_v58 = vsel %vm437_vm4, %v560_v7, %v559_v62  ;;  %v488_v3 = vrot.slane %v475_v56, 4  ;;  %v489_v5 = vrot.slane %v475_v56, 5  ;;  %v490_v9 = vrot.slane %v475_v56, 6 }
 0x17c   :  { %v563_v10 = vsel %vm440_vm5, %v562_v26, %v561_v58  ;;  %v491_v11 = vrot.slane %v475_v56, 7  ;;  %v1424_v13 = vsub.f32 %v1346_v63, %v475_v56  ;;  %v1427_v16 = vsub.f32 %v1317_v24, %v485_v40  ;;  %v395_v56 = vld [vmem:[%s1568_s4 + $0x18] sm:$0xff]  ;;  %v397_v26 = vld [vmem:[#allocation5] sm:$0xff]  ;;  %v403_v58 = vld [vmem:[#allocation5 + $0x30] sm:$0xff] }
 0x17d   :  { %v565_v28 = vsel %vm443_vm6, %v564_v59, %v563_v10  ;;  %v1431_v12 = vsub.f32 %v1349_v0, %v486_v57  ;;  %v1434_v18 = vsub.f32 %v1363_v8, %v487_v2  ;;  %v1437_v19 = vsub.f32 %v1352_v39, %v488_v3  ;;  %v399_v59 = vld [vmem:[#allocation5 + $0x10] sm:$0xff]  ;;  %v401_v40 = vld [vmem:[#allocation5 + $0x20] sm:$0xff]  ;;  %v402_v57 = vld [vmem:[#allocation5 + $0x28] sm:$0xff] }
 0x17e   :  { %v567_v20 = vsel %vm446_vm8, %v566_v60, %v565_v28  ;;  %v1441_v21 = vsub.f32 %v1360_v4, %v489_v5  ;;  %v1444_v63 = vsub.f32 %v1354_v48, %v490_v9  ;;  %v1448_v35 = vsub.f32 %v1366_v52, %v491_v11  ;;  %v404_v3 = vld [vmem:[#allocation5 + $0x38] sm:$0xff]  ;;  %v405_v9 = vld [vmem:[#allocation5 + $0x40] sm:$0xff]  ;;  %v406_v10 = vld [vmem:[#allocation5 + $0x48] sm:$0xff] }
 0x17f   :  { %v569_v24 = vsel %vm449_vm7, %v568_v61, %v567_v20  ;;  %v533_v0 = vmul.f32 %v1427_v16, %v1427_v16  ;;  %v534_v39 = vmul.f32 %v1431_v12, %v1431_v12  ;;  %v535_v4 = vmul.f32 %v1434_v18, %v1434_v18  ;;  %v400_v61 = vld [vmem:[#allocation5 + $0x18] sm:$0xff]  ;;  %v407_v28 = vld [vmem:[#allocation5 + $0x50] sm:$0xff] }
 0x180   :  { %v586_v8 = vsel %vm204_vm1, %v569_v24, 0.0  ;;  %v536_v48 = vmul.f32 %v1437_v19, %v1437_v19  ;;  %v532_v37 = vmul.f32 %v1424_v13, %v1424_v13  ;;  %v537_v52 = vmul.f32 %v1441_v21, %v1441_v21  ;;  %v408_v20 = vld [vmem:[#allocation5 + $0x58] sm:$0xff] }
 0x181   :  { %587 = vadd.xlane.f32.xlu0 %v586_v8  ;;  %v570_v23 = vrot.slane %v533_v0, 7  ;;  %v572_v27 = vrot.slane %v534_v39, 6  ;;  %v538_v29 = vmul.f32 %v1444_v63, %v1444_v63  ;;  %v539_v31 = vmul.f32 %v1448_v35, %v1448_v35  ;;  %v409_v0 = vld [vmem:[#allocation5 + $0x60] sm:$0xff]  ;;  %v410_v39 = vld [vmem:[#allocation5 + $0x68] sm:$0xff] }
 0x182   :  { %v574_v34 = vrot.slane %v535_v4, 5  ;;  %v576_v42 = vrot.slane %v536_v48, 4  ;;  %v578_v25 = vrot.slane %v537_v52, 3  ;;  %v998_v55 = vpack.c.bf16 %v393_v53, %v392_v51 }
 0x183   :  { %v571_v32 = vsel %vm431_vm2, %v570_v23, %v532_v37  ;;  %v580_v15 = vrot.slane %v538_v29, 2  ;;  %v582_v38 = vrot.slane %v539_v31, 1  ;;  %v1002_v7 = vpack.c.bf16 %v395_v56, %v394_v54  ;;  %v1490_v31 = vld [vmem:[%s1566_s2] ss:$0 sm:$0xff] }
 0x184   :  { %v573_v41 = vsel %vm434_vm3, %v572_v27, %v571_v32  ;;  %999 = vmatprep.subr.bf16.mxu0 %v998_v55  ;;  %v1006_v60 = vpack.c.bf16 %v398_v17, %v397_v26  ;;  %v1010_v62 = vpack.c.bf16 %v400_v61, %v399_v59  ;;  %v1014_v2 = vpack.c.bf16 %v402_v57, %v401_v40 }
 0x185   :  { %v575_v43 = vsel %vm437_vm4, %v574_v34, %v573_v41  ;;  %1001 = vmatpush3.bf16.msra.mxu0 %v998_v55  ;;  %v1018_v5 = vpack.c.bf16 %v404_v3, %v403_v58  ;;  %v1022_v11 = vpack.c.bf16 %v406_v10, %v405_v9  ;;  %v1026_v24 = vpack.c.bf16 %v408_v20, %v407_v28 }
 0x186   :  { %v577_v6 = vsel %vm440_vm5, %v576_v42, %v575_v43  ;;  %1003 = vmatprep.subr.bf16.mxu0 %v1002_v7  ;;  %1007 = vmatprep.subr.bf16.mxu1 %v1006_v60  ;;  %v1030_v8 = vpack.c.bf16 %v410_v39, %v409_v0 }
 0x187   :  { %v579_v22 = vsel %vm443_vm6, %v578_v25, %v577_v6  ;;  %1009 = vmatpush3.bf16.msra.mxu1 %v1006_v60 }
 0x188   :  { %v581_v33 = vsel %vm446_vm8, %v580_v15, %v579_v22  ;;  %1011 = vmatprep.subr.bf16.mxu1 %v1010_v62 }
 0x189   :  { %v583_v30 = vsel %vm449_vm7, %v582_v38, %v581_v33  ;;  %1005 = vmatpush3.bf16.msra.mxu0 %v1002_v7 }
 0x18a   :  { %v589_v50 = vsel %vm204_vm1, %v583_v30, 0.0 }
 0x18b   :  { %590 = vadd.xlane.f32.xlu1 %v589_v50  ;;  %1013 = vmatpush3.bf16.msra.mxu1 %v1010_v62 }
 0x18c   :  { %1015 = vmatprep.subr.bf16.mxu1 %v1014_v2 }
 0x18f   :  { %1017 = vmatpush3.bf16.msra.mxu1 %v1014_v2 }
 0x190   :  { %1019 = vmatprep.subr.bf16.mxu1 %v1018_v5 }
 0x193   :  { %1021 = vmatpush3.bf16.msra.mxu1 %v1018_v5 }
 0x194   :  { %1023 = vmatprep.subr.bf16.mxu1 %v1022_v11 }
 0x197   :  { %1025 = vmatpush3.bf16.msra.mxu1 %v1022_v11 }
 0x198   :  { %1027 = vmatprep.subr.bf16.mxu1 %v1026_v24 }
 0x19b   :  { %1029 = vmatpush3.bf16.msra.mxu1 %v1026_v24 }
 0x19c   :  { %1031 = vmatprep.subr.bf16.mxu1 %v1030_v8 }
 0x19f   :  { %1033 = vmatpush3.bf16.msra.mxu1 %v1030_v8 }
 0x20e   :  { %v588_v4 = vpop.xlane.xlu0 %587 }
 0x20f   :  { %v592_v48 = vmul.f32 0.03125, %v588_v4 }
 0x211   :  { %v594_v37 = vadd.f32 1e-05, %v592_v48 }
 0x213   :  { %1075 = vrsqrt.f32 %v594_v37 }
 0x218   :  { %v591_v52 = vpop.xlane.xlu1 %590 }
 0x219   :  { %v593_v23 = vmul.f32 0.03125, %v591_v52 }
 0x21b   :  { %v595_v27 = vadd.f32 1e-05, %v593_v23 }
 0x21d   :  { %v1076_v29 = vpop.eup %1075  ;;  %1077 = vrsqrt.f32 %v595_v27 }
 0x21e   :  { %v600_v32 = vrot.slane %v1076_v29, 1  ;;  %v601_v34 = vrot.slane %v1076_v29, 2  ;;  %v602_v41 = vrot.slane %v1076_v29, 3  ;;  %v603_v42 = vrot.slane %v1076_v29, 4 }
 0x21f   :  { %v604_v43 = vrot.slane %v1076_v29, 5  ;;  %v605_v25 = vrot.slane %v1076_v29, 6  ;;  %v606_v6 = vrot.slane %v1076_v29, 7  ;;  %v630_v15 = vmul.f32 %v1076_v29, %v1381_v44 }
 0x220   :  { %v631_v22 = vmul.f32 %v600_v32, %v1384_v36  ;;  %v632_v38 = vmul.f32 %v601_v34, %v1387_v1  ;;  %v633_v33 = vmul.f32 %v602_v41, %v1390_v45  ;;  %v634_v30 = vmul.f32 %v603_v42, %v1393_v46  ;;  %v923_v45 = vld [vmem:[%s1567_s3] ss:$0 sm:$0xff] }
 0x221   :  { %v635_v50 = vmul.f32 %v604_v43, %v1396_v47  ;;  %v636_v51 = vmul.f32 %v605_v25, %v1399_v49  ;;  %v637_v53 = vmul.f32 %v606_v6, %v1401_v14  ;;  %v652_v54 = vmul.f32 %v1490_v31, %v630_v15 }
 0x222   :  { %v653_v55 = vmul.f32 %v1490_v31, %v631_v22  ;;  %v654_v44 = vmul.f32 %v1490_v31, %v632_v38  ;;  %v655_v36 = vmul.f32 %v1490_v31, %v633_v33  ;;  %v656_v1 = vmul.f32 %v1490_v31, %v634_v30 }
 0x223   :  { %v657_v46 = vmul.f32 %v1490_v31, %v635_v50  ;;  %v658_v47 = vmul.f32 %v1490_v31, %v636_v51  ;;  %v659_v49 = vmul.f32 %v1490_v31, %v637_v53  ;;  %v674_v61 = vadd.f32 %v923_v45, %v652_v54 }
 0x224   :  { %v675_v14 = vadd.f32 %v923_v45, %v653_v55  ;;  %v676_v56 = vadd.f32 %v923_v45, %v654_v44  ;;  %v677_v7 = vadd.f32 %v923_v45, %v655_v36  ;;  %v678_v26 = vadd.f32 %v923_v45, %v656_v1 }
 0x225   :  { %v679_v17 = vadd.f32 %v923_v45, %v657_v46  ;;  %v680_v59 = vadd.f32 %v923_v45, %v658_v47  ;;  %v681_v60 = vadd.f32 %v923_v45, %v659_v49 }
 0x226   :  { %v712_v62 = vrot.slane %v675_v14, 7  ;;  %v714_v40 = vrot.slane %v676_v56, 6  ;;  %v716_v57 = vrot.slane %v677_v7, 5  ;;  %v718_v58 = vrot.slane %v678_v26, 4 }
 0x227   :  { %v1078_v2 = vpop.eup %1077  ;;  %v720_v3 = vrot.slane %v679_v17, 3  ;;  %v722_v5 = vrot.slane %v680_v59, 2  ;;  %v724_v9 = vrot.slane %v681_v60, 1  ;;  %v412_v59 = vld [vmem:[#allocation5 + $0x78] sm:$0xff] }
 0x228   :  { %v713_v10 = vsel %vm431_vm2, %v712_v62, %v674_v61  ;;  %v607_v11 = vrot.slane %v1078_v2, 1  ;;  %v608_v28 = vrot.slane %v1078_v2, 2  ;;  %v609_v20 = vrot.slane %v1078_v2, 3  ;;  %v924_v61 = vld [vmem:[%s1569_s5] ss:$0 sm:$0xff]  ;;  %s1123_s5 = scalar_lea.vmem %s910_s26, 256 }
 0x229   :  { %v715_v24 = vsel %vm434_vm3, %v714_v40, %v713_v10  ;;  %v610_v0 = vrot.slane %v1078_v2, 4  ;;  %v611_v39 = vrot.slane %v1078_v2, 5  ;;  %v612_v8 = vrot.slane %v1078_v2, 6  ;;  %p1124_p2 = scmp.ne.s32.totalorder %s910_s26, %s1123_s5  ;;  %p1129_p4 = scmp.lt.s32.totalorder %s1123_s5, %s1123_s5 }
 0x22a   :  { %v717_v4 = vsel %vm437_vm4, %v716_v57, %v715_v24  ;;  %v613_v48 = vrot.slane %v1078_v2, 7  ;;  %v638_v37 = vmul.f32 %v1078_v2, %v1424_v13  ;;  %v639_v52 = vmul.f32 %v607_v11, %v1427_v16 }
 0x22b   :  { %v719_v23 = vsel %vm440_vm5, %v718_v58, %v717_v4  ;;  %v640_v27 = vmul.f32 %v608_v28, %v1431_v12  ;;  %v641_v29 = vmul.f32 %v609_v20, %v1434_v18  ;;  %v642_v32 = vmul.f32 %v610_v0, %v1437_v19  ;;  %p1130_p5 = por %p1129_p4, %p1128_p3 }
 0x22c   :  { %v721_v34 = vsel %vm443_vm6, %v720_v3, %v719_v23  ;;  %v643_v41 = vmul.f32 %v611_v39, %v1441_v21  ;;  %v644_v42 = vmul.f32 %v612_v8, %v1444_v63  ;;  %v645_v43 = vmul.f32 %v613_v48, %v1448_v35 }
 0x22d   :  { %v723_v13 = vsel %vm446_vm8, %v722_v5, %v721_v34  ;;  %v660_v16 = vmul.f32 %v1490_v31, %v638_v37  ;;  %v661_v25 = vmul.f32 %v1490_v31, %v639_v52  ;;  %v662_v12 = vmul.f32 %v1490_v31, %v640_v27  ;;  %v927_v5 = vld [vmem:[%s1571_s7] ss:$0 sm:$0xff]  ;;  %p1131_p6 = pnand %p1130_p5, %p1124_p2 }
 0x22e   :  { %v725_v18 = vsel %vm449_vm7, %v724_v9, %v723_v13  ;;  %v663_v19 = vmul.f32 %v1490_v31, %v641_v29  ;;  %v664_v6 = vmul.f32 %v1490_v31, %v642_v32  ;;  %v665_v21 = vmul.f32 %v1490_v31, %v643_v41 }
 0x22f   :  { %960 = vmatprep.mubr.msk.f32.mxu0 %vm204_vm1, %v725_v18  ;;  %v666_v63 = vmul.f32 %v1490_v31, %v644_v42  ;;  %v667_v35 = vmul.f32 %v1490_v31, %v645_v43  ;;  %v683_v15 = vadd.f32 %v923_v45, %v661_v25  ;;  %v684_v22 = vadd.f32 %v923_v45, %v662_v12 }
 0x230   :  { %v685_v38 = vadd.f32 %v923_v45, %v663_v19  ;;  %v686_v33 = vadd.f32 %v923_v45, %v664_v6  ;;  %v682_v30 = vadd.f32 %v923_v45, %v660_v16  ;;  %v687_v50 = vadd.f32 %v923_v45, %v665_v21 }
 0x231   :  { %v726_v51 = vrot.slane %v683_v15, 7  ;;  %v688_v53 = vadd.f32 %v923_v45, %v666_v63  ;;  %v728_v54 = vrot.slane %v684_v22, 6  ;;  %v689_v55 = vadd.f32 %v923_v45, %v667_v35  ;;  %v411_v45 = vld [vmem:[#allocation5 + $0x70] sm:$0xff] }
 0x232   :  { %v730_v36 = vrot.slane %v685_v38, 5  ;;  %v732_v46 = vrot.slane %v686_v33, 4  ;;  %v734_v49 = vrot.slane %v687_v50, 3  ;;  %v1034_v60 = vpack.c.bf16 %v412_v59, %v411_v45 }
 0x233   :  { %v727_v44 = vsel %vm431_vm2, %v726_v51, %v682_v30  ;;  %v736_v14 = vrot.slane %v688_v53, 2  ;;  %v738_v7 = vrot.slane %v689_v55, 1 }
 0x234   :  { %v729_v1 = vsel %vm434_vm3, %v728_v54, %v727_v44  ;;  %1035 = vmatprep.subr.bf16.mxu1 %v1034_v60 }
 0x235   :  { %v731_v47 = vsel %vm437_vm4, %v730_v36, %v729_v1  ;;  %1037 = vmatpush3.bf16.msra.mxu1 %v1034_v60 }
 0x236   :  { %v733_v31 = vsel %vm440_vm5, %v732_v46, %v731_v47 }
 0x237   :  { %v735_v56 = vsel %vm443_vm6, %v734_v49, %v733_v31 }
 0x238   :  { %v737_v26 = vsel %vm446_vm8, %v736_v14, %v735_v56 }
 0x239   :  { %v739_v17 = vsel %vm449_vm7, %v738_v7, %v737_v26 }
 0x23a   :  { %961 = vmatmul.mubr.msk.f32.vlgmr.msra.gmra.mrb[0].mxu0 %vm204_vm1, %v739_v17 }
 0x30d   :  { %v962_v62 = vpop.f32.mrb[0].mxu0 }
 0x30e   :  { %v816_v40 = vadd.f32 %v962_v62, %v924_v61  ;;  %v810_v57 = vpop.f32.mrb[1].mxu0 }
 0x30f   :  { %v811_v2 = vadd.f32 %v924_v61, %v810_v57 }
 0x310   :  { %v820_v3 = vmax.f32 %v816_v40, 0.0 }
 0x311   :  { %v819_v58 = vmax.f32 %v811_v2, 0.0 }
 0x313   :  { %995 = vmatprep.mubr.f32.mxu1 %v819_v58 }
 0x314   :  { %996 = vmatmul.mubr.f32.vlgmr.msra.gmra.mrb[0].mxu1 %v820_v3 }
 0x3e7   :  { %v997_v9 = vpop.f32.mrb[0].mxu1 }
 0x3e8   :  { %v899_v10 = vadd.f32 %v997_v9, %v927_v5  ;;  %v893_v11 = vpop.f32.mrb[1].mxu1 }
 0x3e9   :  { %v894_v28 = vadd.f32 %v927_v5, %v893_v11 }
 0x3ea   :  { %903 = vst [vmem:[#allocation7 + $0x8] sm:$0xff] %v899_v10 }
 0x3eb   :  { %902 = vst [vmem:[#allocation7] sm:$0xff] %v894_v28 }
 0x3ec   :  { %1134 = shalt.err (!%p1131_p6)
}
 0x3ed   :  { %s1135_s7 = scalar_lea.hbm %s1572_s8, 256 }
 0x3ee   :  { %p1136_p7 = scmp.ne.s32.totalorder %s1572_s8, %s1135_s7  ;;  %p1139_p8 = scmp.lt.u32.totalorder %s1135_s7, %s1572_s8 }
 0x3f0   :  { %p1141_p9 = pnand %p1139_p8, %p1136_p7 }
 0x3f2   :  { %1144 = shalt.err (!%p1141_p9)
}
 0x3f3   :  { %915 = dma.vmem_to_hbm [thread:$0]  %s910_s26, 256, %s1572_s8, [#allocation4], %s1152_s15, %s1152_s15, %s1153_s16  }
 0x3f4   :  { %1149 = dma.done.wait [#allocation4], 256  }
 0x3f5   :  { %1150 = vsyncadd [#allocation4], 4294967040 }
 0x3f6   :  { %919 = vsyncpa [#allocation3], 1 }
 0x3f7   :  { %920 = vsyncpa [#allocation6], 1 }
 0x3f8   :  { %921 = vsyncpa [#allocation4], 1 }

</bundles_post_ra>
